<compile_context>
chip_gen: v6e
topology: v6e:2x2x1
jax: 0.10.0
libtpu: 0.0.40
codegen_flags: <defaults>
</compile_context>

<pallas_src>
import functools

import jax
import jax.numpy as jnp
from jax.experimental import pallas as pl
from jax.experimental.pallas import tpu as pltpu


def _round_up(n: int, m: int) -> int:
    return ((n + m - 1) // m) * m


def mlp_kernel(x_ref, w_in_ref, b_in_ref, w_mid_ref, b_mid_ref,
               w_out_ref, b_out_ref, o_ref, *,
               deep_layers: int, input_dim: int, output_dim: int):
    """Whole forward pass for one batch tile, entirely in VMEM.

    Transposed (batch-on-lanes) layout:
      x_ref     : (D_in, TB)
      w_in_ref  : (Hp, D_in)       b_in_ref : (Hp, 1)
      w_mid_ref : (L, Hp, Hp)      b_mid_ref: (L, Hp, 1)
      w_out_ref : (D_out, Hp)      b_out_ref: (D_out, 1)
      o_ref     : (D_out, TB)
    """
    x = x_ref[...]                                        # (D_in, TB)

    # --- Input layer.  Tiny fan-in: VPU broadcast FMAs instead of a K=2 MXU push.
    if input_dim <= 8:
        acc = w_in_ref[:, 0:1] * x[0:1, :]                # (Hp, TB)
        for d in range(1, input_dim):
            acc = acc + w_in_ref[:, d:d + 1] * x[d:d + 1, :]
    else:
        acc = jnp.dot(w_in_ref[...], x, preferred_element_type=jnp.float32)
    # jnp.tanh lowers to the EUP transcendental path (separate bundle slot).
    h = jnp.tanh(acc + b_in_ref[...])                     # (Hp, TB)

    # --- Hidden layers: static unroll over the small, fixed layer count.
    for l in range(deep_layers):
        h = jnp.tanh(
            jnp.dot(w_mid_ref[l], h, preferred_element_type=jnp.float32)
            + b_mid_ref[l]
        )

    # --- Output layer.  Tiny fan-out: VPU broadcast FMAs instead of an M=1 MXU
    # push + MRF pop right before the output store.
    if output_dim <= 8:
        wo = w_out_ref[...]                               # (D_out, Hp)
        hp = wo.shape[1]
        out = wo[:, 0:1] * h[0:1, :]                      # (D_out, TB)
        for k in range(1, hp):
            out = out + wo[:, k:k + 1] * h[k:k + 1, :]
        out = out + b_out_ref[...]
    else:
        out = (jnp.dot(w_out_ref[...], h, preferred_element_type=jnp.float32)
               + b_out_ref[...])

    o_ref[...] = out.astype(o_ref.dtype)                  # lane-dense store


@functools.partial(jax.jit, static_argnames=("batch_tile",))
def neural_network_forward(x, params, *, batch_tile: int = 2048):
    """Batched forward: x [B, D_in] -> [B, D_out].

    Weights are PyTorch-layout: W (fan_out, fan_in), b (fan_out, 1).
    The whole wrapper is jitted so the transpose / pad / slice plumbing fuses.
    """
    w_in, b_in, w_mid, b_mid, w_out, b_out = params
    B, d_in = x.shape
    deep_layers = w_mid.shape[0]
    hidden = w_in.shape[0]
    d_out = w_out.shape[0]

    # Pad hidden width to a full sublane multiple (25 -> 32).  Padded rows / biases /
    # fan-in columns are zero, so tanh(0) = 0 and padded lanes contribute nothing.
    hp = _round_up(hidden, 8)
    if hp != hidden:
        p = hp - hidden
        w_in = jnp.pad(w_in, ((0, p), (0, 0)))
        b_in = jnp.pad(b_in, ((0, p), (0, 0)))
        w_mid = jnp.pad(w_mid, ((0, 0), (0, p), (0, p)))
        b_mid = jnp.pad(b_mid, ((0, 0), (0, p), (0, 0)))
        w_out = jnp.pad(w_out, ((0, 0), (0, p)))

    # Lane-dense batch tile: multiple of 128, big enough to amortize per-step overhead,
    # never bigger than the padded batch.
    b_pad128 = _round_up(B, 128)
    tb = min(_round_up(max(batch_tile, 128), 128), b_pad128)
    # Guarantee >= 2 grid steps whenever there is enough batch, so the "parallel"
    # grid axis can shard across v7x's two TensorCores (harmless elsewhere).
    if b_pad128 >= 256:
        tb = min(tb, max(128, (b_pad128 // 2) // 128 * 128))
    b_pad = _round_up(B, tb)

    # Batch-on-lanes layout: transpose + zero-pad (layout plumbing only, fused by jit).
    xT = x.T                                              # (D_in, B)
    if b_pad != B:
        xT = jnp.pad(xT, ((0, 0), (0, b_pad - B)))

    grid = (b_pad // tb,)
    kernel = functools.partial(mlp_kernel, deep_layers=deep_layers,
                               input_dim=d_in, output_dim=d_out)

    outT = pl.pallas_call(
        kernel,
        out_shape=jax.ShapeDtypeStruct((d_out, b_pad), x.dtype),
        grid_spec=pltpu.PrefetchScalarGridSpec(
            num_scalar_prefetch=0,
            grid=grid,
            in_specs=[
                # batch-tiled input, batch on the lane axis
                pl.BlockSpec((d_in, tb), lambda i: (0, i)),
                # parameters: full arrays, same (resident) block for every grid step
                pl.BlockSpec((hp, d_in), lambda i: (0, 0)),
                pl.BlockSpec((hp, 1), lambda i: (0, 0)),
                pl.BlockSpec((deep_layers, hp, hp), lambda i: (0, 0, 0)),
                pl.BlockSpec((deep_layers, hp, 1), lambda i: (0, 0, 0)),
                pl.BlockSpec((d_out, hp), lambda i: (0, 0)),
                pl.BlockSpec((d_out, 1), lambda i: (0, 0)),
            ],
            out_specs=pl.BlockSpec((d_out, tb), lambda i: (0, i)),
        ),
        compiler_params=pltpu.CompilerParams(
            dimension_semantics=("parallel",),   # batch tiles across TCs on v7x
        ),
    )(xT, w_in, b_in, w_mid, b_mid, w_out, b_out)

    return outT[:, :B].T                                  # (B, D_out)


def init_params(key, input_dimension, output_dimension,
                deep_layers=5, hidden_layers_dimension=25):
    """Deterministic init mimicking torch.nn.Linear's U(-1/sqrt(fan_in), 1/sqrt(fan_in)).

    PyTorch layout: W (fan_out, fan_in), b (fan_out, 1).
    """
    H = hidden_layers_dimension
    keys = jax.random.split(key, 6)

    def uni(k, shape, fan_in):
        bound = 1.0 / jnp.sqrt(jnp.float32(fan_in))
        return jax.random.uniform(k, shape, jnp.float32, -bound, bound)

    w_in = uni(keys[0], (H, input_dimension), input_dimension)
    b_in = uni(keys[1], (H, 1), input_dimension)
    w_mid = uni(keys[2], (deep_layers, H, H), H)
    b_mid = uni(keys[3], (deep_layers, H, 1), H)
    w_out = uni(keys[4], (output_dimension, H), H)
    b_out = uni(keys[5], (output_dimension, 1), H)
    return (w_in, b_in, w_mid, b_mid, w_out, b_out)


def reference_forward(x, params):
    """Pure-JAX reference (identical math to the PyTorch module's forward)."""
    w_in, b_in, w_mid, b_mid, w_out, b_out = params
    h = jnp.tanh(x @ w_in.T + b_in[:, 0])
    for l in range(w_mid.shape[0]):
        h = jnp.tanh(h @ w_mid[l].T + b_mid[l, :, 0])
    return h @ w_out.T + b_out[:, 0]


# TODO(synk): the optimizer / LR-scheduler / torch.func.jacobian machinery of the module
# is training utility code with no kernel equivalent; only the forward pass is implemented.

if __name__ == "__main__":
    # Small shapes consistent with the module defaults:
    # input_dimension=2 (typical PINN coords), output_dimension=1,
    # deep_layers=5, hidden_layers_dimension=25, batch=16.
    input_dimension = 2
    output_dimension = 1
    deep_layers = 5
    hidden = 25
    batch = 16

    key = jax.random.PRNGKey(0)
    kx, kp = jax.random.split(key)
    x = jax.random.normal(kx, (batch, input_dimension), jnp.float32)
    params = init_params(kp, input_dimension, output_dimension,
                         deep_layers=deep_layers,
                         hidden_layers_dimension=hidden)

    out = neural_network_forward(x, params)
    out = jax.block_until_ready(out)

    ref = reference_forward(x, params)
    assert out.shape == (batch, output_dimension)
    assert jnp.allclose(out, ref, atol=1e-5, rtol=1e-5), "mismatch vs. JAX reference"

    # Also exercise a batch that needs >= 2 grid steps (v7x 2-TC path) and padding.
    x2 = jax.random.normal(jax.random.PRNGKey(1), (300, input_dimension), jnp.float32)
    out2 = jax.block_until_ready(neural_network_forward(x2, params))
    assert jnp.allclose(out2, reference_forward(x2, params), atol=1e-5, rtol=1e-5)

    print("KERNEL_OK")
</pallas_src>

<mosaic_0001>
module attributes {stable_mosaic.version = 11 : i64} {
  func.func @mlp_kernel(%arg0: i32, %arg1: memref<2x128xf32, #tpu.memory_space<vmem>>, %arg2: memref<32x2xf32, #tpu.memory_space<vmem>>, %arg3: memref<32x1xf32, #tpu.memory_space<vmem>>, %arg4: memref<5x32x32xf32, #tpu.memory_space<vmem>>, %arg5: memref<5x32x1xf32, #tpu.memory_space<vmem>>, %arg6: memref<1x32xf32, #tpu.memory_space<vmem>>, %arg7: memref<1x1xf32, #tpu.memory_space<vmem>>, %arg8: memref<1x128xf32, #tpu.memory_space<vmem>>) attributes {dimension_semantics = [#tpu.dimension_semantics<parallel>], iteration_bounds = array<i64: 1>, scalar_prefetch = 0 : i64, scratch_operands = 0 : i64, tpu.core_type = #tpu.core_type<tc>, window_params = [{transform_indices = @transform_0, window_bounds = array<i64: 2, 128>}, {pipeline_mode = #tpu.pipeline_mode<synchronous>, transform_indices = @transform_1, window_bounds = array<i64: 32, 2>}, {pipeline_mode = #tpu.pipeline_mode<synchronous>, transform_indices = @transform_2, window_bounds = array<i64: 32, 1>}, {pipeline_mode = #tpu.pipeline_mode<synchronous>, transform_indices = @transform_3, window_bounds = array<i64: 5, 32, 32>}, {pipeline_mode = #tpu.pipeline_mode<synchronous>, transform_indices = @transform_4, window_bounds = array<i64: 5, 32, 1>}, {pipeline_mode = #tpu.pipeline_mode<synchronous>, transform_indices = @transform_5, window_bounds = array<i64: 1, 32>}, {pipeline_mode = #tpu.pipeline_mode<synchronous>, transform_indices = @transform_6, window_bounds = array<i64: 1, 1>}, {transform_indices = @transform_7, window_bounds = array<i64: 1, 128>}]} {
    %c0 = arith.constant 0 : index
    %c0_0 = arith.constant 0 : index
    %0 = vector.load %arg1[%c0, %c0_0] : memref<2x128xf32, #tpu.memory_space<vmem>>, vector<2x128xf32>
    %c0_1 = arith.constant 0 : index
    %c0_2 = arith.constant 0 : index
    %1 = vector.load %arg2[%c0_1, %c0_2] : memref<32x2xf32, #tpu.memory_space<vmem>>, vector<32x1xf32>
    %2 = vector.extract_strided_slice %0 {offsets = [0, 0], sizes = [1, 128], strides = [1, 1]} : vector<2x128xf32> to vector<1x128xf32>
    %3 = vector.broadcast %1 : vector<32x1xf32> to vector<32x128xf32>
    %4 = vector.broadcast %2 : vector<1x128xf32> to vector<32x128xf32>
    %5 = arith.mulf %3, %4 : vector<32x128xf32>
    %c0_3 = arith.constant 0 : index
    %c1 = arith.constant 1 : index
    %6 = vector.load %arg2[%c0_3, %c1] : memref<32x2xf32, #tpu.memory_space<vmem>>, vector<32x1xf32>
    %7 = vector.extract_strided_slice %0 {offsets = [1, 0], sizes = [1, 128], strides = [1, 1]} : vector<2x128xf32> to vector<1x128xf32>
    %8 = vector.broadcast %6 : vector<32x1xf32> to vector<32x128xf32>
    %9 = vector.broadcast %7 : vector<1x128xf32> to vector<32x128xf32>
    %10 = arith.mulf %8, %9 : vector<32x128xf32>
    %11 = arith.addf %5, %10 : vector<32x128xf32>
    %c0_4 = arith.constant 0 : index
    %c0_5 = arith.constant 0 : index
    %12 = vector.load %arg3[%c0_4, %c0_5] : memref<32x1xf32, #tpu.memory_space<vmem>>, vector<32x1xf32>
    %13 = vector.broadcast %12 : vector<32x1xf32> to vector<32x128xf32>
    %14 = arith.addf %11, %13 : vector<32x128xf32>
    %15 = math.tanh %14 : vector<32x128xf32>
    %c0_6 = arith.constant 0 : index
    %c0_7 = arith.constant 0 : index
    %c0_8 = arith.constant 0 : index
    %16 = vector.load %arg4[%c0_6, %c0_7, %c0_8] : memref<5x32x32xf32, #tpu.memory_space<vmem>>, vector<1x32x32xf32>
    %17 = vector.shape_cast %16 : vector<1x32x32xf32> to vector<32x32xf32>
    %cst = arith.constant dense<0.000000e+00> : vector<32x128xf32>
    %18 = tpu.matmul %17, %15, %cst {dimension_numbers = #tpu.dot_dimension_numbers<[1], [0], [0], [1], [0, 0, 1, 1], [], []>} : vector<32x32xf32>, vector<32x128xf32>, vector<32x128xf32> -> vector<32x128xf32>
    %c0_9 = arith.constant 0 : index
    %c0_10 = arith.constant 0 : index
    %c0_11 = arith.constant 0 : index
    %19 = vector.load %arg5[%c0_9, %c0_10, %c0_11] : memref<5x32x1xf32, #tpu.memory_space<vmem>>, vector<1x32x1xf32>
    %20 = vector.shape_cast %19 : vector<1x32x1xf32> to vector<32x1xf32>
    %21 = vector.broadcast %20 : vector<32x1xf32> to vector<32x128xf32>
    %22 = arith.addf %18, %21 : vector<32x128xf32>
    %23 = math.tanh %22 : vector<32x128xf32>
    %c1_12 = arith.constant 1 : index
    %c0_13 = arith.constant 0 : index
    %c0_14 = arith.constant 0 : index
    %24 = vector.load %arg4[%c1_12, %c0_13, %c0_14] : memref<5x32x32xf32, #tpu.memory_space<vmem>>, vector<1x32x32xf32>
    %25 = vector.shape_cast %24 : vector<1x32x32xf32> to vector<32x32xf32>
    %cst_15 = arith.constant dense<0.000000e+00> : vector<32x128xf32>
    %26 = tpu.matmul %25, %23, %cst_15 {dimension_numbers = #tpu.dot_dimension_numbers<[1], [0], [0], [1], [0, 0, 1, 1], [], []>} : vector<32x32xf32>, vector<32x128xf32>, vector<32x128xf32> -> vector<32x128xf32>
    %c1_16 = arith.constant 1 : index
    %c0_17 = arith.constant 0 : index
    %c0_18 = arith.constant 0 : index
    %27 = vector.load %arg5[%c1_16, %c0_17, %c0_18] : memref<5x32x1xf32, #tpu.memory_space<vmem>>, vector<1x32x1xf32>
    %28 = vector.shape_cast %27 : vector<1x32x1xf32> to vector<32x1xf32>
    %29 = vector.broadcast %28 : vector<32x1xf32> to vector<32x128xf32>
    %30 = arith.addf %26, %29 : vector<32x128xf32>
    %31 = math.tanh %30 : vector<32x128xf32>
    %c2 = arith.constant 2 : index
    %c0_19 = arith.constant 0 : index
    %c0_20 = arith.constant 0 : index
    %32 = vector.load %arg4[%c2, %c0_19, %c0_20] : memref<5x32x32xf32, #tpu.memory_space<vmem>>, vector<1x32x32xf32>
    %33 = vector.shape_cast %32 : vector<1x32x32xf32> to vector<32x32xf32>
    %cst_21 = arith.constant dense<0.000000e+00> : vector<32x128xf32>
    %34 = tpu.matmul %33, %31, %cst_21 {dimension_numbers = #tpu.dot_dimension_numbers<[1], [0], [0], [1], [0, 0, 1, 1], [], []>} : vector<32x32xf32>, vector<32x128xf32>, vector<32x128xf32> -> vector<32x128xf32>
    %c2_22 = arith.constant 2 : index
    %c0_23 = arith.constant 0 : index
    %c0_24 = arith.constant 0 : index
    %35 = vector.load %arg5[%c2_22, %c0_23, %c0_24] : memref<5x32x1xf32, #tpu.memory_space<vmem>>, vector<1x32x1xf32>
    %36 = vector.shape_cast %35 : vector<1x32x1xf32> to vector<32x1xf32>
    %37 = vector.broadcast %36 : vector<32x1xf32> to vector<32x128xf32>
    %38 = arith.addf %34, %37 : vector<32x128xf32>
    %39 = math.tanh %38 : vector<32x128xf32>
    %c3 = arith.constant 3 : index
    %c0_25 = arith.constant 0 : index
    %c0_26 = arith.constant 0 : index
    %40 = vector.load %arg4[%c3, %c0_25, %c0_26] : memref<5x32x32xf32, #tpu.memory_space<vmem>>, vector<1x32x32xf32>
    %41 = vector.shape_cast %40 : vector<1x32x32xf32> to vector<32x32xf32>
    %cst_27 = arith.constant dense<0.000000e+00> : vector<32x128xf32>
    %42 = tpu.matmul %41, %39, %cst_27 {dimension_numbers = #tpu.dot_dimension_numbers<[1], [0], [0], [1], [0, 0, 1, 1], [], []>} : vector<32x32xf32>, vector<32x128xf32>, vector<32x128xf32> -> vector<32x128xf32>
    %c3_28 = arith.constant 3 : index
    %c0_29 = arith.constant 0 : index
    %c0_30 = arith.constant 0 : index
    %43 = vector.load %arg5[%c3_28, %c0_29, %c0_30] : memref<5x32x1xf32, #tpu.memory_space<vmem>>, vector<1x32x1xf32>
    %44 = vector.shape_cast %43 : vector<1x32x1xf32> to vector<32x1xf32>
    %45 = vector.broadcast %44 : vector<32x1xf32> to vector<32x128xf32>
    %46 = arith.addf %42, %45 : vector<32x128xf32>
    %47 = math.tanh %46 : vector<32x128xf32>
    %c4 = arith.constant 4 : index
    %c0_31 = arith.constant 0 : index
    %c0_32 = arith.constant 0 : index
    %48 = vector.load %arg4[%c4, %c0_31, %c0_32] : memref<5x32x32xf32, #tpu.memory_space<vmem>>, vector<1x32x32xf32>
    %49 = vector.shape_cast %48 : vector<1x32x32xf32> to vector<32x32xf32>
    %cst_33 = arith.constant dense<0.000000e+00> : vector<32x128xf32>
    %50 = tpu.matmul %49, %47, %cst_33 {dimension_numbers = #tpu.dot_dimension_numbers<[1], [0], [0], [1], [0, 0, 1, 1], [], []>} : vector<32x32xf32>, vector<32x128xf32>, vector<32x128xf32> -> vector<32x128xf32>
    %c4_34 = arith.constant 4 : index
    %c0_35 = arith.constant 0 : index
    %c0_36 = arith.constant 0 : index
    %51 = vector.load %arg5[%c4_34, %c0_35, %c0_36] : memref<5x32x1xf32, #tpu.memory_space<vmem>>, vector<1x32x1xf32>
    %52 = vector.shape_cast %51 : vector<1x32x1xf32> to vector<32x1xf32>
    %53 = vector.broadcast %52 : vector<32x1xf32> to vector<32x128xf32>
    %54 = arith.addf %50, %53 : vector<32x128xf32>
    %55 = math.tanh %54 : vector<32x128xf32>
    %c0_37 = arith.constant 0 : index
    %c0_38 = arith.constant 0 : index
    %56 = vector.load %arg6[%c0_37, %c0_38] : memref<1x32xf32, #tpu.memory_space<vmem>>, vector<1x32xf32>
    %57 = vector.extract_strided_slice %56 {offsets = [0, 0], sizes = [1, 1], strides = [1, 1]} : vector<1x32xf32> to vector<1x1xf32>
    %58 = vector.extract_strided_slice %55 {offsets = [0, 0], sizes = [1, 128], strides = [1, 1]} : vector<32x128xf32> to vector<1x128xf32>
    %59 = vector.broadcast %57 : vector<1x1xf32> to vector<1x128xf32>
    %60 = arith.mulf %59, %58 : vector<1x128xf32>
    %61 = vector.extract_strided_slice %56 {offsets = [0, 1], sizes = [1, 1], strides = [1, 1]} : vector<1x32xf32> to vector<1x1xf32>
    %62 = vector.extract_strided_slice %55 {offsets = [1, 0], sizes = [1, 128], strides = [1, 1]} : vector<32x128xf32> to vector<1x128xf32>
    %63 = vector.broadcast %61 : vector<1x1xf32> to vector<1x128xf32>
    %64 = arith.mulf %63, %62 : vector<1x128xf32>
    %65 = arith.addf %60, %64 : vector<1x128xf32>
    %66 = vector.extract_strided_slice %56 {offsets = [0, 2], sizes = [1, 1], strides = [1, 1]} : vector<1x32xf32> to vector<1x1xf32>
    %67 = vector.extract_strided_slice %55 {offsets = [2, 0], sizes = [1, 128], strides = [1, 1]} : vector<32x128xf32> to vector<1x128xf32>
    %68 = vector.broadcast %66 : vector<1x1xf32> to vector<1x128xf32>
    %69 = arith.mulf %68, %67 : vector<1x128xf32>
    %70 = arith.addf %65, %69 : vector<1x128xf32>
    %71 = vector.extract_strided_slice %56 {offsets = [0, 3], sizes = [1, 1], strides = [1, 1]} : vector<1x32xf32> to vector<1x1xf32>
    %72 = vector.extract_strided_slice %55 {offsets = [3, 0], sizes = [1, 128], strides = [1, 1]} : vector<32x128xf32> to vector<1x128xf32>
    %73 = vector.broadcast %71 : vector<1x1xf32> to vector<1x128xf32>
    %74 = arith.mulf %73, %72 : vector<1x128xf32>
    %75 = arith.addf %70, %74 : vector<1x128xf32>
    %76 = vector.extract_strided_slice %56 {offsets = [0, 4], sizes = [1, 1], strides = [1, 1]} : vector<1x32xf32> to vector<1x1xf32>
    %77 = vector.extract_strided_slice %55 {offsets = [4, 0], sizes = [1, 128], strides = [1, 1]} : vector<32x128xf32> to vector<1x128xf32>
    %78 = vector.broadcast %76 : vector<1x1xf32> to vector<1x128xf32>
    %79 = arith.mulf %78, %77 : vector<1x128xf32>
    %80 = arith.addf %75, %79 : vector<1x128xf32>
    %81 = vector.extract_strided_slice %56 {offsets = [0, 5], sizes = [1, 1], strides = [1, 1]} : vector<1x32xf32> to vector<1x1xf32>
    %82 = vector.extract_strided_slice %55 {offsets = [5, 0], sizes = [1, 128], strides = [1, 1]} : vector<32x128xf32> to vector<1x128xf32>
    %83 = vector.broadcast %81 : vector<1x1xf32> to vector<1x128xf32>
    %84 = arith.mulf %83, %82 : vector<1x128xf32>
    %85 = arith.addf %80, %84 : vector<1x128xf32>
    %86 = vector.extract_strided_slice %56 {offsets = [0, 6], sizes = [1, 1], strides = [1, 1]} : vector<1x32xf32> to vector<1x1xf32>
    %87 = vector.extract_strided_slice %55 {offsets = [6, 0], sizes = [1, 128], strides = [1, 1]} : vector<32x128xf32> to vector<1x128xf32>
    %88 = vector.broadcast %86 : vector<1x1xf32> to vector<1x128xf32>
    %89 = arith.mulf %88, %87 : vector<1x128xf32>
    %90 = arith.addf %85, %89 : vector<1x128xf32>
    %91 = vector.extract_strided_slice %56 {offsets = [0, 7], sizes = [1, 1], strides = [1, 1]} : vector<1x32xf32> to vector<1x1xf32>
    %92 = vector.extract_strided_slice %55 {offsets = [7, 0], sizes = [1, 128], strides = [1, 1]} : vector<32x128xf32> to vector<1x128xf32>
    %93 = vector.broadcast %91 : vector<1x1xf32> to vector<1x128xf32>
    %94 = arith.mulf %93, %92 : vector<1x128xf32>
    %95 = arith.addf %90, %94 : vector<1x128xf32>
    %96 = vector.extract_strided_slice %56 {offsets = [0, 8], sizes = [1, 1], strides = [1, 1]} : vector<1x32xf32> to vector<1x1xf32>
    %97 = vector.extract_strided_slice %55 {offsets = [8, 0], sizes = [1, 128], strides = [1, 1]} : vector<32x128xf32> to vector<1x128xf32>
    %98 = vector.broadcast %96 : vector<1x1xf32> to vector<1x128xf32>
    %99 = arith.mulf %98, %97 : vector<1x128xf32>
    %100 = arith.addf %95, %99 : vector<1x128xf32>
    %101 = vector.extract_strided_slice %56 {offsets = [0, 9], sizes = [1, 1], strides = [1, 1]} : vector<1x32xf32> to vector<1x1xf32>
    %102 = vector.extract_strided_slice %55 {offsets = [9, 0], sizes = [1, 128], strides = [1, 1]} : vector<32x128xf32> to vector<1x128xf32>
    %103 = vector.broadcast %101 : vector<1x1xf32> to vector<1x128xf32>
    %104 = arith.mulf %103, %102 : vector<1x128xf32>
    %105 = arith.addf %100, %104 : vector<1x128xf32>
    %106 = vector.extract_strided_slice %56 {offsets = [0, 10], sizes = [1, 1], strides = [1, 1]} : vector<1x32xf32> to vector<1x1xf32>
    %107 = vector.extract_strided_slice %55 {offsets = [10, 0], sizes = [1, 128], strides = [1, 1]} : vector<32x128xf32> to vector<1x128xf32>
    %108 = vector.broadcast %106 : vector<1x1xf32> to vector<1x128xf32>
    %109 = arith.mulf %108, %107 : vector<1x128xf32>
    %110 = arith.addf %105, %109 : vector<1x128xf32>
    %111 = vector.extract_strided_slice %56 {offsets = [0, 11], sizes = [1, 1], strides = [1, 1]} : vector<1x32xf32> to vector<1x1xf32>
    %112 = vector.extract_strided_slice %55 {offsets = [11, 0], sizes = [1, 128], strides = [1, 1]} : vector<32x128xf32> to vector<1x128xf32>
    %113 = vector.broadcast %111 : vector<1x1xf32> to vector<1x128xf32>
    %114 = arith.mulf %113, %112 : vector<1x128xf32>
    %115 = arith.addf %110, %114 : vector<1x128xf32>
    %116 = vector.extract_strided_slice %56 {offsets = [0, 12], sizes = [1, 1], strides = [1, 1]} : vector<1x32xf32> to vector<1x1xf32>
    %117 = vector.extract_strided_slice %55 {offsets = [12, 0], sizes = [1, 128], strides = [1, 1]} : vector<32x128xf32> to vector<1x128xf32>
    %118 = vector.broadcast %116 : vector<1x1xf32> to vector<1x128xf32>
    %119 = arith.mulf %118, %117 : vector<1x128xf32>
    %120 = arith.addf %115, %119 : vector<1x128xf32>
    %121 = vector.extract_strided_slice %56 {offsets = [0, 13], sizes = [1, 1], strides = [1, 1]} : vector<1x32xf32> to vector<1x1xf32>
    %122 = vector.extract_strided_slice %55 {offsets = [13, 0], sizes = [1, 128], strides = [1, 1]} : vector<32x128xf32> to vector<1x128xf32>
    %123 = vector.broadcast %121 : vector<1x1xf32> to vector<1x128xf32>
    %124 = arith.mulf %123, %122 : vector<1x128xf32>
    %125 = arith.addf %120, %124 : vector<1x128xf32>
    %126 = vector.extract_strided_slice %56 {offsets = [0, 14], sizes = [1, 1], strides = [1, 1]} : vector<1x32xf32> to vector<1x1xf32>
    %127 = vector.extract_strided_slice %55 {offsets = [14, 0], sizes = [1, 128], strides = [1, 1]} : vector<32x128xf32> to vector<1x128xf32>
    %128 = vector.broadcast %126 : vector<1x1xf32> to vector<1x128xf32>
    %129 = arith.mulf %128, %127 : vector<1x128xf32>
    %130 = arith.addf %125, %129 : vector<1x128xf32>
    %131 = vector.extract_strided_slice %56 {offsets = [0, 15], sizes = [1, 1], strides = [1, 1]} : vector<1x32xf32> to vector<1x1xf32>
    %132 = vector.extract_strided_slice %55 {offsets = [15, 0], sizes = [1, 128], strides = [1, 1]} : vector<32x128xf32> to vector<1x128xf32>
    %133 = vector.broadcast %131 : vector<1x1xf32> to vector<1x128xf32>
    %134 = arith.mulf %133, %132 : vector<1x128xf32>
    %135 = arith.addf %130, %134 : vector<1x128xf32>
    %136 = vector.extract_strided_slice %56 {offsets = [0, 16], sizes = [1, 1], strides = [1, 1]} : vector<1x32xf32> to vector<1x1xf32>
    %137 = vector.extract_strided_slice %55 {offsets = [16, 0], sizes = [1, 128], strides = [1, 1]} : vector<32x128xf32> to vector<1x128xf32>
    %138 = vector.broadcast %136 : vector<1x1xf32> to vector<1x128xf32>
    %139 = arith.mulf %138, %137 : vector<1x128xf32>
    %140 = arith.addf %135, %139 : vector<1x128xf32>
    %141 = vector.extract_strided_slice %56 {offsets = [0, 17], sizes = [1, 1], strides = [1, 1]} : vector<1x32xf32> to vector<1x1xf32>
    %142 = vector.extract_strided_slice %55 {offsets = [17, 0], sizes = [1, 128], strides = [1, 1]} : vector<32x128xf32> to vector<1x128xf32>
    %143 = vector.broadcast %141 : vector<1x1xf32> to vector<1x128xf32>
    %144 = arith.mulf %143, %142 : vector<1x128xf32>
    %145 = arith.addf %140, %144 : vector<1x128xf32>
    %146 = vector.extract_strided_slice %56 {offsets = [0, 18], sizes = [1, 1], strides = [1, 1]} : vector<1x32xf32> to vector<1x1xf32>
    %147 = vector.extract_strided_slice %55 {offsets = [18, 0], sizes = [1, 128], strides = [1, 1]} : vector<32x128xf32> to vector<1x128xf32>
    %148 = vector.broadcast %146 : vector<1x1xf32> to vector<1x128xf32>
    %149 = arith.mulf %148, %147 : vector<1x128xf32>
    %150 = arith.addf %145, %149 : vector<1x128xf32>
    %151 = vector.extract_strided_slice %56 {offsets = [0, 19], sizes = [1, 1], strides = [1, 1]} : vector<1x32xf32> to vector<1x1xf32>
    %152 = vector.extract_strided_slice %55 {offsets = [19, 0], sizes = [1, 128], strides = [1, 1]} : vector<32x128xf32> to vector<1x128xf32>
    %153 = vector.broadcast %151 : vector<1x1xf32> to vector<1x128xf32>
    %154 = arith.mulf %153, %152 : vector<1x128xf32>
    %155 = arith.addf %150, %154 : vector<1x128xf32>
    %156 = vector.extract_strided_slice %56 {offsets = [0, 20], sizes = [1, 1], strides = [1, 1]} : vector<1x32xf32> to vector<1x1xf32>
    %157 = vector.extract_strided_slice %55 {offsets = [20, 0], sizes = [1, 128], strides = [1, 1]} : vector<32x128xf32> to vector<1x128xf32>
    %158 = vector.broadcast %156 : vector<1x1xf32> to vector<1x128xf32>
    %159 = arith.mulf %158, %157 : vector<1x128xf32>
    %160 = arith.addf %155, %159 : vector<1x128xf32>
    %161 = vector.extract_strided_slice %56 {offsets = [0, 21], sizes = [1, 1], strides = [1, 1]} : vector<1x32xf32> to vector<1x1xf32>
    %162 = vector.extract_strided_slice %55 {offsets = [21, 0], sizes = [1, 128], strides = [1, 1]} : vector<32x128xf32> to vector<1x128xf32>
    %163 = vector.broadcast %161 : vector<1x1xf32> to vector<1x128xf32>
    %164 = arith.mulf %163, %162 : vector<1x128xf32>
    %165 = arith.addf %160, %164 : vector<1x128xf32>
    %166 = vector.extract_strided_slice %56 {offsets = [0, 22], sizes = [1, 1], strides = [1, 1]} : vector<1x32xf32> to vector<1x1xf32>
    %167 = vector.extract_strided_slice %55 {offsets = [22, 0], sizes = [1, 128], strides = [1, 1]} : vector<32x128xf32> to vector<1x128xf32>
    %168 = vector.broadcast %166 : vector<1x1xf32> to vector<1x128xf32>
    %169 = arith.mulf %168, %167 : vector<1x128xf32>
    %170 = arith.addf %165, %169 : vector<1x128xf32>
    %171 = vector.extract_strided_slice %56 {offsets = [0, 23], sizes = [1, 1], strides = [1, 1]} : vector<1x32xf32> to vector<1x1xf32>
    %172 = vector.extract_strided_slice %55 {offsets = [23, 0], sizes = [1, 128], strides = [1, 1]} : vector<32x128xf32> to vector<1x128xf32>
    %173 = vector.broadcast %171 : vector<1x1xf32> to vector<1x128xf32>
    %174 = arith.mulf %173, %172 : vector<1x128xf32>
    %175 = arith.addf %170, %174 : vector<1x128xf32>
    %176 = vector.extract_strided_slice %56 {offsets = [0, 24], sizes = [1, 1], strides = [1, 1]} : vector<1x32xf32> to vector<1x1xf32>
    %177 = vector.extract_strided_slice %55 {offsets = [24, 0], sizes = [1, 128], strides = [1, 1]} : vector<32x128xf32> to vector<1x128xf32>
    %178 = vector.broadcast %176 : vector<1x1xf32> to vector<1x128xf32>
    %179 = arith.mulf %178, %177 : vector<1x128xf32>
    %180 = arith.addf %175, %179 : vector<1x128xf32>
    %181 = vector.extract_strided_slice %56 {offsets = [0, 25], sizes = [1, 1], strides = [1, 1]} : vector<1x32xf32> to vector<1x1xf32>
    %182 = vector.extract_strided_slice %55 {offsets = [25, 0], sizes = [1, 128], strides = [1, 1]} : vector<32x128xf32> to vector<1x128xf32>
    %183 = vector.broadcast %181 : vector<1x1xf32> to vector<1x128xf32>
    %184 = arith.mulf %183, %182 : vector<1x128xf32>
    %185 = arith.addf %180, %184 : vector<1x128xf32>
    %186 = vector.extract_strided_slice %56 {offsets = [0, 26], sizes = [1, 1], strides = [1, 1]} : vector<1x32xf32> to vector<1x1xf32>
    %187 = vector.extract_strided_slice %55 {offsets = [26, 0], sizes = [1, 128], strides = [1, 1]} : vector<32x128xf32> to vector<1x128xf32>
    %188 = vector.broadcast %186 : vector<1x1xf32> to vector<1x128xf32>
    %189 = arith.mulf %188, %187 : vector<1x128xf32>
    %190 = arith.addf %185, %189 : vector<1x128xf32>
    %191 = vector.extract_strided_slice %56 {offsets = [0, 27], sizes = [1, 1], strides = [1, 1]} : vector<1x32xf32> to vector<1x1xf32>
    %192 = vector.extract_strided_slice %55 {offsets = [27, 0], sizes = [1, 128], strides = [1, 1]} : vector<32x128xf32> to vector<1x128xf32>
    %193 = vector.broadcast %191 : vector<1x1xf32> to vector<1x128xf32>
    %194 = arith.mulf %193, %192 : vector<1x128xf32>
    %195 = arith.addf %190, %194 : vector<1x128xf32>
    %196 = vector.extract_strided_slice %56 {offsets = [0, 28], sizes = [1, 1], strides = [1, 1]} : vector<1x32xf32> to vector<1x1xf32>
    %197 = vector.extract_strided_slice %55 {offsets = [28, 0], sizes = [1, 128], strides = [1, 1]} : vector<32x128xf32> to vector<1x128xf32>
    %198 = vector.broadcast %196 : vector<1x1xf32> to vector<1x128xf32>
    %199 = arith.mulf %198, %197 : vector<1x128xf32>
    %200 = arith.addf %195, %199 : vector<1x128xf32>
    %201 = vector.extract_strided_slice %56 {offsets = [0, 29], sizes = [1, 1], strides = [1, 1]} : vector<1x32xf32> to vector<1x1xf32>
    %202 = vector.extract_strided_slice %55 {offsets = [29, 0], sizes = [1, 128], strides = [1, 1]} : vector<32x128xf32> to vector<1x128xf32>
    %203 = vector.broadcast %201 : vector<1x1xf32> to vector<1x128xf32>
    %204 = arith.mulf %203, %202 : vector<1x128xf32>
    %205 = arith.addf %200, %204 : vector<1x128xf32>
    %206 = vector.extract_strided_slice %56 {offsets = [0, 30], sizes = [1, 1], strides = [1, 1]} : vector<1x32xf32> to vector<1x1xf32>
    %207 = vector.extract_strided_slice %55 {offsets = [30, 0], sizes = [1, 128], strides = [1, 1]} : vector<32x128xf32> to vector<1x128xf32>
    %208 = vector.broadcast %206 : vector<1x1xf32> to vector<1x128xf32>
    %209 = arith.mulf %208, %207 : vector<1x128xf32>
    %210 = arith.addf %205, %209 : vector<1x128xf32>
    %211 = vector.extract_strided_slice %56 {offsets = [0, 31], sizes = [1, 1], strides = [1, 1]} : vector<1x32xf32> to vector<1x1xf32>
    %212 = vector.extract_strided_slice %55 {offsets = [31, 0], sizes = [1, 128], strides = [1, 1]} : vector<32x128xf32> to vector<1x128xf32>
    %213 = vector.broadcast %211 : vector<1x1xf32> to vector<1x128xf32>
    %214 = arith.mulf %213, %212 : vector<1x128xf32>
    %215 = arith.addf %210, %214 : vector<1x128xf32>
    %c0_39 = arith.constant 0 : index
    %c0_40 = arith.constant 0 : index
    %216 = vector.load %arg7[%c0_39, %c0_40] : memref<1x1xf32, #tpu.memory_space<vmem>>, vector<1x1xf32>
    %217 = vector.broadcast %216 : vector<1x1xf32> to vector<1x128xf32>
    %218 = arith.addf %215, %217 : vector<1x128xf32>
    %c0_41 = arith.constant 0 : index
    %c0_42 = arith.constant 0 : index
    %219 = vector.load %arg8[%c0_41, %c0_42] : memref<1x128xf32, #tpu.memory_space<vmem>>, vector<1x128xf32>
    tpu.vector_store %arg8[%c0_41, %c0_42], %218 {strides = array<i32>} : memref<1x128xf32, #tpu.memory_space<vmem>>, vector<1x128xf32>,
    return
  }
  func.func @transform_0(%arg0: i32) -> (i32, i32) {
    %c0_i32 = arith.constant 0 : i32
    %c0_i32_0 = arith.constant 0 : i32
    return %c0_i32, %arg0 : i32, i32
  }
  func.func @transform_1(%arg0: i32) -> (i32, i32) {
    %c0_i32 = arith.constant 0 : i32
    %c0_i32_0 = arith.constant 0 : i32
    %c0_i32_1 = arith.constant 0 : i32
    return %c0_i32, %c0_i32_0 : i32, i32
  }
  func.func @transform_2(%arg0: i32) -> (i32, i32) {
    %c0_i32 = arith.constant 0 : i32
    %c0_i32_0 = arith.constant 0 : i32
    %c0_i32_1 = arith.constant 0 : i32
    return %c0_i32, %c0_i32_0 : i32, i32
  }
  func.func @transform_3(%arg0: i32) -> (i32, i32, i32) {
    %c0_i32 = arith.constant 0 : i32
    %c0_i32_0 = arith.constant 0 : i32
    %c0_i32_1 = arith.constant 0 : i32
    %c0_i32_2 = arith.constant 0 : i32
    return %c0_i32, %c0_i32_0, %c0_i32_1 : i32, i32, i32
  }
  func.func @transform_4(%arg0: i32) -> (i32, i32, i32) {
    %c0_i32 = arith.constant 0 : i32
    %c0_i32_0 = arith.constant 0 : i32
    %c0_i32_1 = arith.constant 0 : i32
    %c0_i32_2 = arith.constant 0 : i32
    return %c0_i32, %c0_i32_0, %c0_i32_1 : i32, i32, i32
  }
  func.func @transform_5(%arg0: i32) -> (i32, i32) {
    %c0_i32 = arith.constant 0 : i32
    %c0_i32_0 = arith.constant 0 : i32
    %c0_i32_1 = arith.constant 0 : i32
    return %c0_i32, %c0_i32_0 : i32, i32
  }
  func.func @transform_6(%arg0: i32) -> (i32, i32) {
    %c0_i32 = arith.constant 0 : i32
    %c0_i32_0 = arith.constant 0 : i32
    %c0_i32_1 = arith.constant 0 : i32
    return %c0_i32, %c0_i32_0 : i32, i32
  }
  func.func @transform_7(%arg0: i32) -> (i32, i32) {
    %c0_i32 = arith.constant 0 : i32
    %c0_i32_0 = arith.constant 0 : i32
    return %c0_i32, %arg0 : i32, i32
  }
}

</mosaic_0001>

<bundles_post_ra>
// kernel: neural_network_forward.1
= control target key start
LH: loop header
LB: loop body
LE: loop exit
PB: predicated region body
PF: predicated region fallthrough
CT: control target
= control target key end

     0   :  { %v1486_v0 = vmov 1   ;;  %v1487_v1 = vmov 0   ;;  %vm149_vm0 = vcmask 261120   ;;  %v53_v32 = vlaneseq  ;;  %s1844_s1 = inlined_call_operand.vmem [shape: f32[32,2], index: 1, kind: input, shape index: {}]   ;;  %s1845_s2 = inlined_call_operand.vmem [shape: f32[32,1], index: 2, kind: input, shape index: {}]   ;;  %s1846_s4 = inlined_call_operand.vmem [shape: f32[5,32,1], index: 4, kind: input, shape index: {}]   ;;  %s1847_s3 = inlined_call_operand.vmem [shape: f32[5,32,32], index: 3, kind: input, shape index: {}]   ;;  %s1848_s5 = inlined_call_operand.vmem [shape: f32[1,32], index: 5, kind: input, shape index: {}]   ;;  %s1849_s0 = inlined_call_operand.vmem [shape: f32[2,128], index: 0, kind: input, shape index: {}]   ;;  %s1850_s6 = inlined_call_operand.<no memory space> [shape: f32[1,1], index: 6, kind: input, shape index: {}]   ;;  %s1851_s7 = inlined_call_operand.vmem [shape: f32[1,128], index: 7, kind: output, shape index: {}]  }
   0x1   :  { %1398 = vset.pattern.permute.xlu0 %v1486_v0  ;;  %1399 = vset.pattern.permute.xlu1 %v1487_v1  ;;  %v32_v2 = vld [vmem:[%s1844_s1 + $0x18] sm:$0xff]  ;;  %v31_v3 = vld [vmem:[%s1844_s1 + $0x10] sm:$0xff]  ;;  %v30_v4 = vld [vmem:[%s1844_s1 + $0x8] sm:$0xff] }
   0x2   :  { %74 = vperm.xlu0 %1398, %v32_v2   ;;  %45 = vperm.xlu1 %1399, %v31_v3   ;;  %v29_v5 = vld [vmem:[%s1844_s1] sm:$0xff]  ;;  %v92_v6 = vld [vmem:[%s1845_s2 + $0x18] sm:$0xff]  ;;  %v90_v7 = vld [vmem:[%s1845_s2 + $0x8] sm:$0xff]  ;;  %v54_v33 = vshrl.u32 %v53_v32, 7 }
   0x3   :  { %v128_v8 = vld [vmem:[%s1846_s4 + $0x18] sm:$0xff]  ;;  %v91_v9 = vld [vmem:[%s1845_s2 + $0x10] sm:$0xff]  ;;  %v126_v10 = vld [vmem:[%s1846_s4 + $0x8] sm:$0xff] }
   0x4   :  { %v89_v11 = vld [vmem:[%s1845_s2] sm:$0xff]  ;;  %v1207_v12 = vld [vmem:[%s1846_s4 + $0x38] sm:$0xff]  ;;  %v127_v13 = vld [vmem:[%s1846_s4 + $0x10] sm:$0xff]  ;;  %v79_v36 = vsub.s32 1, %v54_v33  ;;  %v1661_v37 = vsub.s32 0, %v54_v33 }
   0x5   :  { %v1205_v14 = vld [vmem:[%s1846_s4 + $0x28] sm:$0xff]  ;;  %v125_v15 = vld [vmem:[%s1846_s4] sm:$0xff]  ;;  %v1219_v16 = vld [vmem:[%s1846_s4 + $0x58] sm:$0xff] }
   0x6   :  { %1400 = vset.pattern.permute.xlu1 %v1486_v0  ;;  %66 = vperm.xlu0 %1398, %v30_v4   ;;  %v1206_v17 = vld [vmem:[%s1846_s4 + $0x30] sm:$0xff]  ;;  %v1217_v18 = vld [vmem:[%s1846_s4 + $0x48] sm:$0xff]  ;;  %v121_v19 = vld [vmem:[%s1847_s3] sm:$0xff] }
   0x7   :  { %70 = vperm.xlu1 %1400, %v31_v3   ;;  %v1204_v20 = vld [vmem:[%s1846_s4 + $0x20] sm:$0xff]  ;;  %1296 = vmatprep.mubr.msk.f32.mxu0 %vm149_vm0, %v121_v19  ;;  %v1231_v21 = vld [vmem:[%s1846_s4 + $0x78] sm:$0xff]  ;;  %v1218_v22 = vld [vmem:[%s1846_s4 + $0x50] sm:$0xff] }
   0x8   :  { %v1229_v23 = vld [vmem:[%s1846_s4 + $0x68] sm:$0xff]  ;;  %v1216_v24 = vld [vmem:[%s1846_s4 + $0x40] sm:$0xff]  ;;  %v1230_v26 = vld [vmem:[%s1846_s4 + $0x70] sm:$0xff] }
   0x9   :  { %v1240_v25 = vld [vmem:[%s1846_s4 + $0x80] sm:$0xff]  ;;  %v1242_v27 = vld [vmem:[%s1846_s4 + $0x90] sm:$0xff]  ;;  %v1241_v29 = vld [vmem:[%s1846_s4 + $0x88] sm:$0xff] }
   0xa   :  { %1402 = vset.pattern.permute.xlu0 %v1487_v1  ;;  %v1228_v28 = vld [vmem:[%s1846_s4 + $0x60] sm:$0xff]  ;;  %v1243_v31 = vld [vmem:[%s1846_s4 + $0x98] sm:$0xff] }
   0xb   :  { %1401 = vset.pattern.permute.xlu1 %v1487_v1  ;;  %50 = vperm.xlu0 %1402, %v32_v2   ;;  %v1653_v30 = vld [vmem:[%s1848_s5] sm:$0x1] }
   0xc   :  { %40 = vperm.xlu1 %1401, %v30_v4   ;;  %v28_v39 = vld [vmem:[%s1849_s0] sm:$0x3] }
   0xd   :  { %v80_v41 = vrot.slane %v28_v39, %v79_v36  ;;  %v56_v42 = vrot.slane %v28_v39, %v1661_v37  ;;  %v1212_v32 = vld [vmem:[%s1847_s3 + $0x40] sm:$0xff] }
   0xf   :  { %35 = vperm.xlu0 %1402, %v29_v5  }
  0x10   :  { %110 = vperm.xlu1 %1401, %v92_v6  }
  0x13   :  { %100 = vperm.xlu0 %1402, %v90_v7  }
  0x14   :  { %1403 = vset.pattern.permute.xlu1 %v1486_v0 }
  0x15   :  { %62 = vperm.xlu1 %1403, %v29_v5  }
  0x17   :  { %146 = vperm.xlu0 %1402, %v128_v8   ;;  %v122_v8 = vld [vmem:[%s1847_s3 + $0x8] sm:$0xff] }
  0x19   :  { %1404 = vset.pattern.permute.xlu1 %v1487_v1 }
  0x1a   :  { %105 = vperm.xlu1 %1404, %v91_v9   ;;  %v123_v9 = vld [vmem:[%s1847_s3 + $0x10] sm:$0xff] }
  0x1b   :  { %136 = vperm.xlu0 %1402, %v126_v10   ;;  %v124_v10 = vld [vmem:[%s1847_s3 + $0x18] sm:$0xff] }
  0x1e   :  { %95 = vperm.xlu1 %1404, %v89_v11   ;;  %v1200_v11 = vld [vmem:[%s1847_s3 + $0x20] sm:$0xff] }
  0x1f   :  { %278 = vperm.xlu0 %1402, %v1207_v12   ;;  %1310 = vmatprep.mubr.msk.f32.mxu1 %vm149_vm0, %v1200_v11  ;;  %v1489_v11 = vmov 4  }
  0x22   :  { %141 = vperm.xlu1 %1404, %v127_v13  }
  0x23   :  { %268 = vperm.xlu0 %1402, %v1205_v14  }
  0x26   :  { %131 = vperm.xlu1 %1404, %v125_v15  }
  0x27   :  { %409 = vperm.xlu0 %1402, %v1219_v16  }
  0x2a   :  { %273 = vperm.xlu1 %1404, %v1206_v17  }
  0x2b   :  { %399 = vperm.xlu0 %1402, %v1217_v18  }
  0x2e   :  { %263 = vperm.xlu1 %1404, %v1204_v20  }
  0x2f   :  { %540 = vperm.xlu0 %1402, %v1231_v21  }
  0x32   :  { %404 = vperm.xlu1 %1404, %v1218_v22  }
  0x33   :  { %530 = vperm.xlu0 %1402, %v1229_v23  }
  0x36   :  { %394 = vperm.xlu1 %1404, %v1216_v24  }
  0x37   :  { %656 = vperm.xlu0 %1402, %v1240_v25  }
  0x3a   :  { %535 = vperm.xlu1 %1404, %v1230_v26  }
  0x3b   :  { %666 = vperm.xlu0 %1402, %v1242_v27  }
  0x3e   :  { %525 = vperm.xlu1 %1404, %v1228_v28   ;;  %v1201_v28 = vld [vmem:[%s1847_s3 + $0x28] sm:$0xff] }
  0x3f   :  { %1405 = vset.pattern.permute.xlu0 %v1486_v0 }
  0x40   :  { %787 = vperm.xlu0 %1405, %v1653_v30  }
  0x42   :  { %661 = vperm.xlu1 %1404, %v1241_v29   ;;  %v1202_v29 = vld [vmem:[%s1847_s3 + $0x30] sm:$0xff] }
  0x46   :  { %671 = vperm.xlu1 %1404, %v1243_v31   ;;  %v1203_v31 = vld [vmem:[%s1847_s3 + $0x38] sm:$0xff] }
  0x4a   :  { %778 = vperm.xlu1 %1404, %v1653_v30  }
  0x7d   :  { %v46_v34 = vpop.permute.xlu1 %45  ;;  %v75_v35 = vpop.permute.xlu0 %74 }
  0x7e   :  { %v84_v43 = vmul.f32 %v80_v41, %v75_v35  ;;  %v59_v55 = vmul.f32 %v56_v42, %v46_v34 }
  0x81   :  { %v67_v38 = vpop.permute.xlu0 %66 }
  0x82   :  { %v71_v40 = vpop.permute.xlu1 %70  ;;  %v82_v52 = vmul.f32 %v80_v41, %v67_v38 }
  0x83   :  { %v83_v51 = vmul.f32 %v80_v41, %v71_v40 }
  0x85   :  { %v87_v60 = vadd.f32 %v83_v51, %v59_v55  ;;  %v1214_v51 = vld [vmem:[%s1847_s3 + $0x50] sm:$0xff] }
  0x86   :  { %v51_v44 = vpop.permute.xlu0 %50 }
  0x87   :  { %v60_v45 = vmul.f32 %v56_v42, %v51_v44  ;;  %v41_v46 = vpop.permute.xlu1 %40 }
  0x88   :  { %v58_v53 = vmul.f32 %v56_v42, %v41_v46 }
  0x89   :  { %v88_v47 = vadd.f32 %v84_v43, %v60_v45 }
  0x8a   :  { %v36_v50 = vpop.permute.xlu0 %35  ;;  %v86_v58 = vadd.f32 %v82_v52, %v58_v53  ;;  %v1215_v52 = vld [vmem:[%s1847_s3 + $0x58] sm:$0xff]  ;;  %v1224_v53 = vld [vmem:[%s1847_s3 + $0x60] sm:$0xff] }
  0x8b   :  { %v111_v48 = vpop.permute.xlu1 %110  ;;  %v57_v57 = vmul.f32 %v56_v42, %v36_v50  ;;  %v1213_v50 = vld [vmem:[%s1847_s3 + $0x48] sm:$0xff] }
  0x8c   :  { %v116_v49 = vadd.f32 %v111_v48, %v88_v47 }
  0x8e   :  { %1438 = vtanh.f32 %v116_v49  ;;  %v101_v56 = vpop.permute.xlu0 %100 }
  0x8f   :  { %v114_v62 = vadd.f32 %v101_v56, %v86_v58 }
  0x90   :  { %v63_v54 = vpop.permute.xlu1 %62 }
  0x91   :  { %v81_v59 = vmul.f32 %v80_v41, %v63_v54 }
  0x92   :  { %v147_v12 = vpop.permute.xlu0 %146 }
  0x93   :  { %v85_v0 = vadd.f32 %v81_v59, %v57_v57 }
  0x95   :  { %v106_v61 = vpop.permute.xlu1 %105 }
  0x96   :  { %v115_v63 = vadd.f32 %v106_v61, %v87_v60  ;;  %v137_v18 = vpop.permute.xlu0 %136 }
  0x98   :  { %1440 = vtanh.f32 %v115_v63 }
  0x99   :  { %v96_v2 = vpop.permute.xlu1 %95  ;;  %1442 = vtanh.f32 %v114_v62 }
  0x9a   :  { %v113_v3 = vadd.f32 %v96_v2, %v85_v0  ;;  %v279_v33 = vpop.permute.xlu0 %278 }
  0x9b   :  { %v1439_v4 = vpop.eup %1438 }
  0x9c   :  { %1444 = vtanh.f32 %v113_v3  ;;  %1288 = vmatprep.subr.mxu0 %v1439_v4 }
  0x9d   :  { %1289 = vmatpush3.msra.mxu0 %v1439_v4  ;;  %v142_v14 = vpop.permute.xlu1 %141 }
  0x9e   :  { %v269_v40 = vpop.permute.xlu0 %268 }
  0xa1   :  { %v132_v22 = vpop.permute.xlu1 %131 }
  0xa2   :  { %v410_v54 = vpop.permute.xlu0 %409 }
  0xa5   :  { %v1441_v5 = vpop.eup %1440  ;;  %v274_v35 = vpop.permute.xlu1 %273 }
  0xa6   :  { %1290 = vmatprep.subr.mxu0 %v1441_v5  ;;  %v1443_v6 = vpop.eup %1442  ;;  %v400_v60 = vpop.permute.xlu0 %399 }
  0xa7   :  { %1291 = vmatpush3.msra.mxu0 %v1441_v5 }
  0xa8   :  { %1292 = vmatprep.subr.mxu0 %v1443_v6 }
  0xa9   :  { %v1445_v7 = vpop.eup %1444  ;;  %1293 = vmatpush3.msra.mxu0 %v1443_v6  ;;  %v264_v44 = vpop.permute.xlu1 %263 }
  0xaa   :  { %1294 = vmatprep.subr.mxu0 %v1445_v7 }
  0xab   :  { %1295 = vmatpush3.msra.mxu0 %v1445_v7  ;;  %v1225_v7 = vld [vmem:[%s1847_s3 + $0x68] sm:$0xff] }
  0xac   :  { %1297 = vmatmul.mubr.msk.f32.vlgmr.msra.gmra.mxu0 %vm149_vm0, %v122_v8  ;;  %v1226_v8 = vld [vmem:[%s1847_s3 + $0x70] sm:$0xff] }
  0xad   :  { %1299 = vmatprep.mubr.msk.f32.mxu0 %vm149_vm0, %v123_v9  ;;  %v405_v56 = vpop.permute.xlu1 %404  ;;  %v1227_v9 = vld [vmem:[%s1847_s3 + $0x78] sm:$0xff] }
  0xb0   :  { %1300 = vmatmul.mubr.msk.f32.gmra.mxu0 %vm149_vm0, %v124_v10  ;;  %v1488_v10 = vmov 2  }
  0xb1   :  { %1324 = vmatprep.mubr.msk.f32.mxu0 %vm149_vm0, %v1212_v32  ;;  %v395_v0 = vpop.permute.xlu1 %394  ;;  %1406 = vset.pattern.permute.xlu1 %v1488_v10  ;;  %v1506_v32 = vmov 24  }
  0xb2   :  { %800 = vperm.xlu1 %1406, %v1653_v30  }
  0xb6   :  { %1408 = vset.pattern.permute.xlu1 %v1489_v11 }
  0xb7   :  { %826 = vperm.xlu1 %1408, %v1653_v30  }
 0x16c   :  { %v1298_v13 = vpop.f32.mrf.mxu0 }
 0x16d   :  { %v234_v20 = vadd.f32 %v1298_v13, %v137_v18  ;;  %v1236_v13 = vld [vmem:[%s1847_s3 + $0x80] sm:$0xff]  ;;  %v1494_v18 = vmov 6  }
 0x16e   :  { %v228_v15 = vpop.f32.mrf.mxu0 }
 0x16f   :  { %v229_v23 = vadd.f32 %v228_v15, %v132_v22  ;;  %v1491_v15 = vmov 7   ;;  %v1497_v22 = vmov 11  }
 0x170   :  { %v1301_v16 = vpop.f32.mrf.mxu0 }
 0x171   :  { %v244_v17 = vadd.f32 %v1301_v16, %v147_v12  ;;  %v1490_v12 = vmov 5   ;;  %v1492_v16 = vmov 3  }
 0x172   :  { %v238_v19 = vpop.f32.mrf.mxu0  ;;  %1409 = vset.pattern.permute.xlu1 %v1490_v12  ;;  %1407 = vset.pattern.permute.xlu0 %v1492_v16 }
 0x173   :  { %1446 = vtanh.f32 %v244_v17  ;;  %v239_v21 = vadd.f32 %v238_v19, %v142_v14  ;;  %839 = vperm.xlu1 %1409, %v1653_v30   ;;  %v1238_v14 = vld [vmem:[%s1847_s3 + $0x90] sm:$0xff]  ;;  %813 = vperm.xlu0 %1407, %v1653_v30   ;;  %v1493_v17 = vmov 8   ;;  %v12_v19 = vstv %s1850_s6 }
 0x174   :  { %13 = vst [vmem:[#allocation2] sm:$0x1] %v12_v19 }
 0x175   :  { %1448 = vtanh.f32 %v239_v21  ;;  %v1496_v21 = vmov 9  }
 0x176   :  { %1450 = vtanh.f32 %v234_v20  ;;  %v1495_v20 = vmov 10  }
 0x177   :  { %1452 = vtanh.f32 %v229_v23  ;;  %1411 = vset.pattern.permute.xlu1 %v1491_v15  ;;  %1410 = vset.pattern.permute.xlu0 %v1494_v18  ;;  %v1498_v23 = vmov 12  }
 0x178   :  { %865 = vperm.xlu1 %1411, %v1653_v30   ;;  %852 = vperm.xlu0 %1410, %v1653_v30  }
 0x17c   :  { %1412 = vset.pattern.permute.xlu1 %v1493_v17  ;;  %1413 = vset.pattern.permute.xlu0 %v1496_v21 }
 0x17d   :  { %878 = vperm.xlu1 %1412, %v1653_v30   ;;  %888 = vperm.xlu0 %1413, %v1653_v30  }
 0x180   :  { %v1447_v24 = vpop.eup %1446 }
 0x181   :  { %1302 = vmatprep.subr.mxu1 %v1447_v24  ;;  %1414 = vset.pattern.permute.xlu1 %v1495_v20 }
 0x182   :  { %v1449_v25 = vpop.eup %1448  ;;  %1303 = vmatpush3.msra.mxu1 %v1447_v24  ;;  %901 = vperm.xlu1 %1414, %v1653_v30   ;;  %v1499_v24 = vmov 13  }
 0x183   :  { %1304 = vmatprep.subr.mxu1 %v1449_v25  ;;  %v1451_v26 = vpop.eup %1450  ;;  %1416 = vset.pattern.permute.xlu0 %v1498_v23 }
 0x184   :  { %1305 = vmatpush3.msra.mxu1 %v1449_v25  ;;  %v1453_v27 = vpop.eup %1452  ;;  %927 = vperm.xlu0 %1416, %v1653_v30   ;;  %v1500_v25 = vmov 15  }
 0x185   :  { %1306 = vmatprep.subr.mxu1 %v1451_v26 }
 0x186   :  { %1307 = vmatpush3.msra.mxu1 %v1451_v26  ;;  %1415 = vset.pattern.permute.xlu1 %v1497_v22  ;;  %v1501_v26 = vmov 14  }
 0x187   :  { %1308 = vmatprep.subr.mxu1 %v1453_v27  ;;  %914 = vperm.xlu1 %1415, %v1653_v30  }
 0x188   :  { %1309 = vmatpush3.msra.mxu1 %v1453_v27  ;;  %1419 = vset.pattern.permute.xlu0 %v1500_v25  ;;  %v1502_v27 = vmov 18  }
 0x189   :  { %1311 = vmatmul.mubr.msk.f32.vlgmr.msra.gmra.mxu1 %vm149_vm0, %v1201_v28  ;;  %966 = vperm.xlu0 %1419, %v1653_v30   ;;  %v1503_v28 = vmov 16  }
 0x18a   :  { %1313 = vmatprep.mubr.msk.f32.mxu1 %vm149_vm0, %v1202_v29  ;;  %v1504_v29 = vmov 21  }
 0x18b   :  { %1417 = vset.pattern.permute.xlu1 %v1499_v24 }
 0x18c   :  { %940 = vperm.xlu1 %1417, %v1653_v30  }
 0x18d   :  { %1314 = vmatmul.mubr.msk.f32.gmra.mxu1 %vm149_vm0, %v1203_v31  ;;  %1422 = vset.pattern.permute.xlu0 %v1502_v27  ;;  %v1505_v31 = vmov 17  }
 0x18e   :  { %1338 = vmatprep.mubr.msk.f32.mxu1 %vm149_vm0, %v1224_v53  ;;  %1002 = vperm.xlu0 %1422, %v1653_v30  }
 0x190   :  { %1418 = vset.pattern.permute.xlu1 %v1501_v26 }
 0x191   :  { %953 = vperm.xlu1 %1418, %v1653_v30  }
 0x192   :  { %1425 = vset.pattern.permute.xlu0 %v1504_v29 }
 0x193   :  { %1041 = vperm.xlu0 %1425, %v1653_v30  }
 0x195   :  { %1420 = vset.pattern.permute.xlu1 %v1503_v28 }
 0x196   :  { %979 = vperm.xlu1 %1420, %v1653_v30  }
 0x197   :  { %1428 = vset.pattern.permute.xlu0 %v1506_v32 }
 0x198   :  { %1080 = vperm.xlu0 %1428, %v1653_v30  }
 0x19a   :  { %1421 = vset.pattern.permute.xlu1 %v1505_v31 }
 0x19b   :  { %989 = vperm.xlu1 %1421, %v1653_v30  }
 0x249   :  { %v1312_v34 = vpop.f32.mrf.mxu1 }
 0x24a   :  { %v365_v42 = vadd.f32 %v1312_v34, %v269_v40  ;;  %v1508_v34 = vmov 27   ;;  %v1513_v40 = vmov 25  }
 0x24b   :  { %v359_v36 = vpop.f32.mrf.mxu1  ;;  %1431 = vset.pattern.permute.xlu0 %v1508_v34 }
 0x24c   :  { %v360_v45 = vadd.f32 %v359_v36, %v264_v44  ;;  %1116 = vperm.xlu0 %1431, %v1653_v30   ;;  %v1510_v36 = vmov 30   ;;  %v1517_v44 = vmov 31  }
 0x24d   :  { %v1315_v38 = vpop.f32.mrf.mxu1 }
 0x24e   :  { %v375_v39 = vadd.f32 %v1315_v38, %v279_v33  ;;  %v1507_v33 = vmov 19   ;;  %v1511_v38 = vmov 22  }
 0x24f   :  { %v369_v41 = vpop.f32.mrf.mxu1  ;;  %1423 = vset.pattern.permute.xlu1 %v1507_v33 }
 0x250   :  { %1454 = vtanh.f32 %v375_v39  ;;  %v370_v43 = vadd.f32 %v369_v41, %v274_v35  ;;  %1015 = vperm.xlu1 %1423, %v1653_v30   ;;  %v1509_v35 = vmov 20   ;;  %1434 = vset.pattern.permute.xlu0 %v1510_v36  ;;  %v1512_v39 = vmov 23  }
 0x251   :  { %1155 = vperm.xlu0 %1434, %v1653_v30   ;;  %v1514_v41 = vmov 26  }
 0x252   :  { %1456 = vtanh.f32 %v370_v43  ;;  %v1516_v43 = vmov 29  }
 0x253   :  { %1458 = vtanh.f32 %v365_v42  ;;  %v1515_v42 = vmov 28  }
 0x254   :  { %1460 = vtanh.f32 %v360_v45  ;;  %1424 = vset.pattern.permute.xlu1 %v1509_v35  ;;  %v1180_v45 = vld [vmem:[#allocation2] sm:$0x1] }
 0x255   :  { %1028 = vperm.xlu1 %1424, %v1653_v30   ;;  %1437 = vset.pattern.permute.xlu0 %v1487_v1 }
 0x259   :  { %1426 = vset.pattern.permute.xlu1 %v1511_v38 }
 0x25a   :  { %1054 = vperm.xlu1 %1426, %v1653_v30  }
 0x25d   :  { %v1455_v46 = vpop.eup %1454 }
 0x25e   :  { %1316 = vmatprep.subr.mxu0 %v1455_v46  ;;  %1427 = vset.pattern.permute.xlu1 %v1512_v39 }
 0x25f   :  { %v1457_v47 = vpop.eup %1456  ;;  %1317 = vmatpush3.msra.mxu0 %v1455_v46  ;;  %1067 = vperm.xlu1 %1427, %v1653_v30   ;;  %v541_v46 = vpop.permute.xlu0 %540 }
 0x260   :  { %1318 = vmatprep.subr.mxu0 %v1457_v47  ;;  %v1459_v48 = vpop.eup %1458 }
 0x261   :  { %1319 = vmatpush3.msra.mxu0 %v1457_v47  ;;  %v1461_v49 = vpop.eup %1460 }
 0x262   :  { %1320 = vmatprep.subr.mxu0 %v1459_v48 }
 0x263   :  { %1321 = vmatpush3.msra.mxu0 %v1459_v48  ;;  %1429 = vset.pattern.permute.xlu1 %v1513_v40  ;;  %v536_v48 = vpop.permute.xlu1 %535 }
 0x264   :  { %1322 = vmatprep.subr.mxu0 %v1461_v49  ;;  %1090 = vperm.xlu1 %1429, %v1653_v30  }
 0x265   :  { %1323 = vmatpush3.msra.mxu0 %v1461_v49 }
 0x266   :  { %1325 = vmatmul.mubr.msk.f32.vlgmr.msra.gmra.mxu0 %vm149_vm0, %v1213_v50 }
 0x267   :  { %1327 = vmatprep.mubr.msk.f32.mxu0 %vm149_vm0, %v1214_v51 }
 0x268   :  { %1430 = vset.pattern.permute.xlu1 %v1514_v41 }
 0x269   :  { %1103 = vperm.xlu1 %1430, %v1653_v30  }
 0x26a   :  { %1328 = vmatmul.mubr.msk.f32.gmra.mxu0 %vm149_vm0, %v1215_v52  ;;  %v531_v52 = vpop.permute.xlu0 %530 }
 0x26b   :  { %1352 = vmatprep.mubr.msk.f32.mxu0 %vm149_vm0, %v1236_v13 }
 0x26d   :  { %1432 = vset.pattern.permute.xlu1 %v1515_v42 }
 0x26e   :  { %1129 = vperm.xlu1 %1432, %v1653_v30  }
 0x272   :  { %1433 = vset.pattern.permute.xlu1 %v1516_v43 }
 0x273   :  { %1142 = vperm.xlu1 %1433, %v1653_v30  }
 0x277   :  { %1435 = vset.pattern.permute.xlu1 %v1517_v44 }
 0x278   :  { %1168 = vperm.xlu1 %1435, %v1653_v30  }
 0x27c   :  { %1436 = vset.pattern.permute.xlu1 %v1487_v1 }
 0x27d   :  { %1183 = vperm.xlu1 %1436, %v1180_v45  }
 0x326   :  { %v1326_v55 = vpop.f32.mrf.mxu0 }
 0x327   :  { %v496_v62 = vadd.f32 %v1326_v55, %v400_v60  ;;  %v1237_v60 = vld [vmem:[%s1847_s3 + $0x88] sm:$0xff] }
 0x328   :  { %v490_v57 = vpop.f32.mrf.mxu0 }
 0x329   :  { %v491_v2 = vadd.f32 %v490_v57, %v395_v0 }
 0x32a   :  { %v1329_v58 = vpop.f32.mrf.mxu0 }
 0x32b   :  { %v506_v59 = vadd.f32 %v1329_v58, %v410_v54 }
 0x32c   :  { %v500_v61 = vpop.f32.mrf.mxu0 }
 0x32d   :  { %1462 = vtanh.f32 %v506_v59  ;;  %v501_v63 = vadd.f32 %v500_v61, %v405_v56  ;;  %v526_v56 = vpop.permute.xlu1 %525  ;;  %v1239_v61 = vld [vmem:[%s1847_s3 + $0x98] sm:$0xff] }
 0x32f   :  { %1464 = vtanh.f32 %v501_v63 }
 0x330   :  { %1466 = vtanh.f32 %v496_v62 }
 0x331   :  { %1468 = vtanh.f32 %v491_v2  ;;  %v662_v62 = vpop.permute.xlu1 %661 }
 0x335   :  { %v1778_v63 = vpop.permute.xlu1 %671 }
 0x339   :  { %v779_v0 = vpop.permute.xlu1 %778 }
 0x33a   :  { %v1463_v3 = vpop.eup %1462  ;;  %v784_v25 = vrot.slane %v779_v0, %v1661_v37 }
 0x33b   :  { %1330 = vmatprep.subr.mxu1 %v1463_v3 }
 0x33c   :  { %v1465_v4 = vpop.eup %1464  ;;  %1331 = vmatpush3.msra.mxu1 %v1463_v3 }
 0x33d   :  { %1332 = vmatprep.subr.mxu1 %v1465_v4  ;;  %v1467_v5 = vpop.eup %1466  ;;  %v801_v2 = vpop.permute.xlu1 %800 }
 0x33e   :  { %1333 = vmatpush3.msra.mxu1 %v1465_v4  ;;  %v1469_v6 = vpop.eup %1468  ;;  %v806_v22 = vrot.slane %v801_v2, %v1661_v37 }
 0x33f   :  { %1334 = vmatprep.subr.mxu1 %v1467_v5 }
 0x340   :  { %1335 = vmatpush3.msra.mxu1 %v1467_v5 }
 0x341   :  { %1336 = vmatprep.subr.mxu1 %v1469_v6  ;;  %v827_v3 = vpop.permute.xlu1 %826 }
 0x342   :  { %1337 = vmatpush3.msra.mxu1 %v1469_v6  ;;  %v832_v29 = vrot.slane %v827_v3, %v1661_v37 }
 0x343   :  { %1339 = vmatmul.mubr.msk.f32.vlgmr.msra.gmra.mxu1 %vm149_vm0, %v1225_v7 }
 0x344   :  { %1341 = vmatprep.mubr.msk.f32.mxu1 %vm149_vm0, %v1226_v8 }
 0x345   :  { %v840_v4 = vpop.permute.xlu1 %839 }
 0x346   :  { %v845_v34 = vrot.slane %v840_v4, %v1661_v37 }
 0x347   :  { %1342 = vmatmul.mubr.msk.f32.gmra.mxu1 %vm149_vm0, %v1227_v9  ;;  %v657_v9 = vpop.permute.xlu0 %656 }
 0x348   :  { %1355 = vmatprep.mubr.msk.f32.mxu1 %vm149_vm0, %v1238_v14 }
 0x349   :  { %v866_v5 = vpop.permute.xlu1 %865 }
 0x34b   :  { %v667_v14 = vpop.permute.xlu0 %666 }
 0x34d   :  { %v1780_v6 = vpop.permute.xlu1 %878 }
 0x34f   :  { %v788_v16 = vpop.permute.xlu0 %787 }
 0x350   :  { %v793_v20 = vrot.slane %v788_v16, %v1661_v37 }
 0x351   :  { %v1782_v7 = vpop.permute.xlu1 %901 }
 0x353   :  { %v814_v19 = vpop.permute.xlu0 %813 }
 0x354   :  { %v819_v23 = vrot.slane %v814_v19, %v1661_v37 }
 0x355   :  { %v1784_v8 = vpop.permute.xlu1 %914 }
 0x356   :  { %v920_v2 = vrot.slane %v1784_v8, %v1661_v37 }
 0x357   :  { %v853_v28 = vpop.permute.xlu0 %852 }
 0x358   :  { %v858_v38 = vrot.slane %v853_v28, %v1661_v37 }
 0x359   :  { %v1786_v10 = vpop.permute.xlu1 %940 }
 0x35b   :  { %v889_v45 = vpop.permute.xlu0 %888 }
 0x35d   :  { %v1788_v15 = vpop.permute.xlu1 %953 }
 0x35e   :  { %v959_v16 = vrot.slane %v1788_v15, %v1661_v37 }
 0x361   :  { %v1790_v17 = vpop.permute.xlu1 %979 }
 0x365   :  { %v1793_v21 = vpop.permute.xlu1 %989 }
 0x369   :  { %v1800_v35 = vpop.permute.xlu1 %1015 }
 0x403   :  { %v1340_v47 = vpop.f32.mrf.mxu1 }
 0x404   :  { %v627_v54 = vadd.f32 %v1340_v47, %v531_v52  ;;  %v871_v47 = vrot.slane %v866_v5, %v1661_v37  ;;  %v894_v52 = vrot.slane %v889_v45, %v1661_v37 }
 0x405   :  { %v621_v49 = vpop.f32.mrf.mxu1 }
 0x406   :  { %v622_v57 = vadd.f32 %v621_v49, %v526_v56 }
 0x407   :  { %v1343_v50 = vpop.f32.mrf.mxu1 }
 0x408   :  { %v637_v51 = vadd.f32 %v1343_v50, %v541_v46 }
 0x409   :  { %v631_v53 = vpop.f32.mrf.mxu1 }
 0x40a   :  { %1470 = vtanh.f32 %v637_v51  ;;  %v632_v55 = vadd.f32 %v631_v53, %v536_v48  ;;  %v1804_v51 = vpop.permute.xlu1 %1028 }
 0x40c   :  { %1472 = vtanh.f32 %v632_v55 }
 0x40d   :  { %1474 = vtanh.f32 %v627_v54 }
 0x40e   :  { %1476 = vtanh.f32 %v622_v57  ;;  %v1055_v3 = vpop.permute.xlu1 %1054 }
 0x412   :  { %v1068_v8 = vpop.permute.xlu1 %1067 }
 0x417   :  { %v1471_v30 = vpop.eup %1470 }
 0x418   :  { %1344 = vmatprep.subr.mxu0 %v1471_v30  ;;  %1358 = vmatprep.subr.mxu1 %v1471_v30 }
 0x419   :  { %v1473_v1 = vpop.eup %1472  ;;  %1345 = vmatpush3.msra.mxu0 %v1471_v30  ;;  %1362 = vmatpush3.msra.mxu1 %v1471_v30 }
 0x41a   :  { %1346 = vmatprep.subr.mxu0 %v1473_v1  ;;  %1359 = vmatprep.subr.mxu1 %v1473_v1  ;;  %v1475_v58 = vpop.eup %1474 }
 0x41b   :  { %1347 = vmatpush3.msra.mxu0 %v1473_v1  ;;  %1363 = vmatpush3.msra.mxu1 %v1473_v1  ;;  %v1477_v59 = vpop.eup %1476 }
 0x41c   :  { %1348 = vmatprep.subr.mxu0 %v1475_v58  ;;  %1360 = vmatprep.subr.mxu1 %v1475_v58 }
 0x41d   :  { %1349 = vmatpush3.msra.mxu0 %v1475_v58  ;;  %1364 = vmatpush3.msra.mxu1 %v1475_v58  ;;  %v884_v58 = vrot.slane %v1780_v6, %v1661_v37  ;;  %v946_v6 = vrot.slane %v1786_v10, %v1661_v37  ;;  %v995_v10 = vrot.slane %v1793_v21, %v1661_v37 }
 0x41e   :  { %1350 = vmatprep.subr.mxu0 %v1477_v59  ;;  %1361 = vmatprep.subr.mxu1 %v1477_v59 }
 0x41f   :  { %1351 = vmatpush3.msra.mxu0 %v1477_v59  ;;  %1365 = vmatpush3.msra.mxu1 %v1477_v59  ;;  %v907_v59 = vrot.slane %v1782_v7, %v1661_v37 }
 0x420   :  { %1353 = vmatmul.mubr.msk.f32.vlgmr.msra.gmra.mxu0 %vm149_vm0, %v1237_v60  ;;  %1356 = vmatmul.mubr.msk.f32.vlgmr.msra.gmra.mxu1 %vm149_vm0, %v1239_v61  ;;  %v928_v60 = vpop.permute.xlu0 %927 }
 0x421   :  { %v933_v4 = vrot.slane %v928_v60, %v1661_v37 }
 0x4e0   :  { %v1354_v11 = vpop.f32.mrf.mxu0  ;;  %v1357_v36 = vpop.f32.mrf.mxu1 }
 0x4e1   :  { %v758_v18 = vadd.f32 %v1354_v11, %v662_v62 }
 0x4e2   :  { %v752_v12 = vpop.f32.mrf.mxu0  ;;  %v762_v46 = vpop.f32.mrf.mxu1 }
 0x4e3   :  { %v753_v13 = vadd.f32 %v752_v12, %v657_v9  ;;  %v763_v53 = vadd.f32 %v762_v46, %v667_v14  ;;  %v967_v14 = vpop.permute.xlu0 %966 }
 0x4e5   :  { %1478 = vtanh.f32 %v753_v13 }
 0x4e6   :  { %1480 = vtanh.f32 %v758_v18 }
 0x4e7   :  { %1482 = vtanh.f32 %v763_v53 }
 0x4f2   :  { %v1479_v24 = vpop.eup %1478 }
 0x4f3   :  { %v794_v26 = vmul.f32 %v1479_v24, %v793_v20  ;;  %v807_v27 = vmul.f32 %v1479_v24, %v806_v22  ;;  %v785_v31 = vmul.f32 %v1479_v24, %v784_v25  ;;  %v820_v33 = vmul.f32 %v1479_v24, %v819_v23  ;;  %v1481_v57 = vpop.eup %1480 }
 0x4f4   :  { %v833_v41 = vmul.f32 %v1479_v24, %v832_v29  ;;  %v846_v44 = vmul.f32 %v1479_v24, %v845_v34  ;;  %v859_v50 = vmul.f32 %v1479_v24, %v858_v38  ;;  %v872_v56 = vmul.f32 %v1479_v24, %v871_v47  ;;  %v1003_v29 = vpop.permute.xlu0 %1002  ;;  %v1483_v34 = vpop.eup %1482 }
 0x4f5   :  { %v796_v32 = vrot.slane %v794_v26, 1  ;;  %v809_v40 = vrot.slane %v807_v27, 2  ;;  %v822_v43 = vrot.slane %v820_v33, 3  ;;  %v895_v0 = vmul.f32 %v1481_v57, %v894_v52  ;;  %v1091_v38 = vpop.permute.xlu1 %1090 }
 0x4f6   :  { %v835_v49 = vrot.slane %v833_v41, 4  ;;  %v848_v55 = vrot.slane %v846_v44, 5  ;;  %v861_v1 = vrot.slane %v859_v50, 6  ;;  %v874_v62 = vrot.slane %v872_v56, 7 }
 0x4f7   :  { %v798_v39 = vadd.f32 %v796_v32, %v785_v31  ;;  %v885_v9 = vmul.f32 %v1481_v57, %v884_v58  ;;  %v908_v11 = vmul.f32 %v1481_v57, %v907_v59  ;;  %v897_v13 = vrot.slane %v895_v0, 1 }
 0x4f8   :  { %v921_v7 = vmul.f32 %v1481_v57, %v920_v2  ;;  %v934_v20 = vmul.f32 %v1481_v57, %v933_v4  ;;  %v972_v22 = vrot.slane %v967_v14, %v1661_v37  ;;  %v947_v25 = vmul.f32 %v1481_v57, %v946_v6 }
 0x4f9   :  { %v811_v42 = vadd.f32 %v809_v40, %v798_v39  ;;  %v910_v19 = vrot.slane %v908_v11, 2  ;;  %v960_v28 = vmul.f32 %v1481_v57, %v959_v16  ;;  %v768_v31 = vadd.f32 %v1357_v36, %v1778_v63  ;;  %v1042_v63 = vpop.permute.xlu0 %1041 }
 0x4fa   :  { %v923_v24 = vrot.slane %v921_v7, 3  ;;  %v936_v27 = vrot.slane %v934_v20, 4  ;;  %v949_v15 = vrot.slane %v947_v25, 5  ;;  %v973_v33 = vmul.f32 %v1481_v57, %v972_v22 }
 0x4fb   :  { %v824_v48 = vadd.f32 %v822_v43, %v811_v42  ;;  %v985_v39 = vrot.slane %v1790_v17, %v1661_v37  ;;  %v1008_v40 = vrot.slane %v1003_v29, %v1661_v37  ;;  %v962_v42 = vrot.slane %v960_v28, 6 }
 0x4fc   :  { %v1021_v43 = vrot.slane %v1800_v35, %v1661_v37  ;;  %1484 = vtanh.f32 %v768_v31  ;;  %v975_v44 = vrot.slane %v973_v33, 7  ;;  %v996_v45 = vmul.f32 %v1483_v34, %v995_v10 }
 0x4fd   :  { %v837_v54 = vadd.f32 %v835_v49, %v824_v48  ;;  %v1034_v36 = vrot.slane %v1804_v51, %v1661_v37  ;;  %v986_v47 = vmul.f32 %v1483_v34, %v985_v39  ;;  %v1009_v48 = vmul.f32 %v1483_v34, %v1008_v40  ;;  %v1104_v49 = vpop.permute.xlu1 %1103  ;;  %v1081_v57 = vpop.permute.xlu0 %1080 }
 0x4fe   :  { %v1047_v17 = vrot.slane %v1042_v63, %v1661_v37  ;;  %v998_v52 = vrot.slane %v996_v45, 1  ;;  %v1022_v53 = vmul.f32 %v1483_v34, %v1021_v43  ;;  %v1096_v0 = vrot.slane %v1091_v38, %v1661_v37 }
 0x4ff   :  { %v850_v30 = vadd.f32 %v848_v55, %v837_v54  ;;  %v1060_v54 = vrot.slane %v1055_v3, %v1661_v37  ;;  %v1011_v55 = vrot.slane %v1009_v48, 2  ;;  %v1035_v56 = vmul.f32 %v1483_v34, %v1034_v36 }
 0x500   :  { %v1024_v58 = vrot.slane %v1022_v53, 3  ;;  %v1048_v51 = vmul.f32 %v1483_v34, %v1047_v17  ;;  %v1109_v11 = vrot.slane %v1104_v49, %v1661_v37 }
 0x501   :  { %v863_v61 = vadd.f32 %v861_v1, %v850_v30  ;;  %v1073_v30 = vrot.slane %v1068_v8, %v1661_v37  ;;  %v1130_v59 = vpop.permute.xlu1 %1129  ;;  %v1117_v3 = vpop.permute.xlu0 %1116 }
 0x502   :  { %v1050_v4 = vrot.slane %v1048_v51, 5  ;;  %v1135_v8 = vrot.slane %v1130_v59, %v1661_v37 }
 0x503   :  { %v876_v5 = vadd.f32 %v874_v62, %v863_v61  ;;  %v1037_v61 = vrot.slane %v1035_v56, 4  ;;  %v1061_v62 = vmul.f32 %v1483_v34, %v1060_v54 }
 0x505   :  { %v886_v12 = vadd.f32 %v885_v9, %v876_v5  ;;  %v1074_v5 = vmul.f32 %v1483_v34, %v1073_v30  ;;  %v1143_v7 = vpop.permute.xlu1 %1142 }
 0x507   :  { %v899_v18 = vadd.f32 %v897_v13, %v886_v12  ;;  %v1063_v12 = vrot.slane %v1061_v62, 6  ;;  %v1086_v13 = vrot.slane %v1081_v57, %v1661_v37  ;;  %v1076_v16 = vrot.slane %v1074_v5, 7 }
 0x509   :  { %v912_v23 = vadd.f32 %v910_v19, %v899_v18  ;;  %v1485_v9 = vpop.eup %1484  ;;  %v1122_v19 = vrot.slane %v1117_v3, %v1661_v37  ;;  %v1169_v10 = vpop.permute.xlu1 %1168 }
 0x50a   :  { %v1097_v18 = vmul.f32 %v1485_v9, %v1096_v0  ;;  %v1110_v20 = vmul.f32 %v1485_v9, %v1109_v11  ;;  %v1136_v31 = vmul.f32 %v1485_v9, %v1135_v8  ;;  %v1174_v39 = vrot.slane %v1169_v10, %v1661_v37 }
 0x50b   :  { %v925_v26 = vadd.f32 %v923_v24, %v912_v23  ;;  %v1087_v23 = vmul.f32 %v1485_v9, %v1086_v13  ;;  %v1156_v24 = vpop.permute.xlu0 %1155  ;;  %v1123_v28 = vmul.f32 %v1485_v9, %v1122_v19 }
 0x50c   :  { %v1112_v29 = vrot.slane %v1110_v20, 2  ;;  %v1138_v40 = vrot.slane %v1136_v31, 4 }
 0x50d   :  { %v938_v32 = vadd.f32 %v936_v27, %v925_v26  ;;  %v1099_v26 = vrot.slane %v1097_v18, 1  ;;  %v1148_v27 = vrot.slane %v1143_v7, %v1661_v37  ;;  %v1125_v38 = vrot.slane %v1123_v28, 3  ;;  %v1184_v45 = vpop.permute.xlu1 %1183 }
 0x50e   :  { %v1189_v48 = vrot.slane %v1184_v45, %v1661_v37 }
 0x50f   :  { %v951_v41 = vadd.f32 %v949_v15, %v938_v32  ;;  %v1161_v15 = vrot.slane %v1156_v24, %v1661_v37  ;;  %v1149_v33 = vmul.f32 %v1485_v9, %v1148_v27 }
 0x511   :  { %v964_v21 = vadd.f32 %v962_v42, %v951_v41  ;;  %v1162_v42 = vmul.f32 %v1485_v9, %v1161_v15  ;;  %v1151_v43 = vrot.slane %v1149_v33, 5 }
 0x513   :  { %v977_v46 = vadd.f32 %v975_v44, %v964_v21  ;;  %v1175_v44 = vmul.f32 %v1485_v9, %v1174_v39  ;;  %v1164_v36 = vrot.slane %v1162_v42, 6 }
 0x515   :  { %v987_v50 = vadd.f32 %v986_v47, %v977_v46  ;;  %v1177_v46 = vrot.slane %v1175_v44, 7 }
 0x517   :  { %v1000_v35 = vadd.f32 %v998_v52, %v987_v50 }
 0x519   :  { %v1013_v1 = vadd.f32 %v1011_v55, %v1000_v35 }
 0x51b   :  { %v1026_v60 = vadd.f32 %v1024_v58, %v1013_v1 }
 0x51d   :  { %v1039_v2 = vadd.f32 %v1037_v61, %v1026_v60 }
 0x51f   :  { %v1052_v6 = vadd.f32 %v1050_v4, %v1039_v2 }
 0x521   :  { %v1065_v14 = vadd.f32 %v1063_v12, %v1052_v6 }
 0x523   :  { %v1078_v22 = vadd.f32 %v1076_v16, %v1065_v14 }
 0x525   :  { %v1088_v25 = vadd.f32 %v1087_v23, %v1078_v22 }
 0x527   :  { %v1101_v32 = vadd.f32 %v1099_v26, %v1088_v25 }
 0x529   :  { %v1114_v34 = vadd.f32 %v1112_v29, %v1101_v32 }
 0x52b   :  { %v1127_v41 = vadd.f32 %v1125_v38, %v1114_v34 }
 0x52d   :  { %v1140_v21 = vadd.f32 %v1138_v40, %v1127_v41 }
 0x52f   :  { %v1153_v63 = vadd.f32 %v1151_v43, %v1140_v21 }
 0x531   :  { %v1166_v47 = vadd.f32 %v1164_v36, %v1153_v63 }
 0x533   :  { %v1179_v49 = vadd.f32 %v1177_v46, %v1166_v47 }
 0x535   :  { %v1190_v17 = vadd.f32 %v1189_v48, %v1179_v49 }
 0x537   :  { %1191 = vst [vmem:[%s1851_s7] sm:$0x1] %v1190_v17 }

</bundles_post_ra>
